<compile_context>
chip_gen: v5e
topology: v5e:2x2
jax: 0.10.0
libtpu: 0.0.40
codegen_flags: <defaults>
</compile_context>

<pallas_src>
import functools

import jax
import jax.numpy as jnp
from jax import lax
from jax.experimental import pallas as pl
from jax.experimental.pallas import tpu as pltpu

LN_EPS = 1e-5  # nn.LayerNorm default


def msef_kernel(x_ref, par_ref, mask_ref, o_ref, *, W, C8):
    # x_ref / o_ref: (BN, C, H*W) block.
    # par_ref: (C, 12 + 2*C8) packed params  [ln_s | ln_b | dww(9) | dwb | fc1^T | fc2].
    # mask_ref: (4, H*W) edge masks  [col w-1 valid | col w+1 valid | row h-1 valid | row h+1 valid].
    BN, C, HW = x_ref.shape

    # ---- image-invariant prep, hoisted out of the image loop (done once per grid step) ----
    par = par_ref[...]                     # (C, P), one small load
    ln_s = par[:, 0:1]                     # folded LN scale        (C, 1)
    ln_b = par[:, 1:2]                     # folded LN bias         (C, 1)
    dww = par[:, 2:11]                     # depthwise weights      (C, 9), k = kh*3 + kw
    dwb = par[:, 11:12]                    # depthwise bias         (C, 1)
    fc1 = par[:, 12:12 + C8]               # torch fc1 (C8,C) transposed -> (C, C8)
    fc2 = par[:, 12 + C8:12 + 2 * C8]      # torch fc2 (C, C8)

    w_tl, w_tc, w_tr = dww[:, 0:1], dww[:, 1:2], dww[:, 2:3]   # taps reading row h-1
    w_ml, w_mc, w_mr = dww[:, 3:4], dww[:, 4:5], dww[:, 5:6]   # taps reading row h
    w_bl, w_bc, w_br = dww[:, 6:7], dww[:, 7:8], dww[:, 8:9]   # taps reading row h+1

    cm_l = mask_ref[0:1, :]                # 1 iff column w-1 exists (w >= 1)
    cm_r = mask_ref[1:2, :]                # 1 iff column w+1 exists (w <= W-2)
    rm_u = mask_ref[2:3, :]                # 1 iff row    h-1 exists (h >= 1)
    rm_d = mask_ref[3:4, :]                # 1 iff row    h+1 exists (h <= H-2)

    inv_c = jnp.float32(1.0 / C)

    def process_image(b):
        xf = x_ref[b].astype(jnp.float32)                      # (C, HW), lane-dense

        # ---- LayerNorm over C (sublane axis), one-pass stats; affine+gamma/beta folded ----
        mean = jnp.sum(xf, axis=0, keepdims=True) * inv_c
        ex2 = jnp.sum(xf * xf, axis=0, keepdims=True) * inv_c
        var = ex2 - mean * mean
        xn = (xf - mean) * lax.rsqrt(var + LN_EPS)
        xn = xn * ln_s + ln_b

        # ---- depthwise 3x3 conv (padding=1): separable tap sharing, only 4 XLU rolls ----
        # column-shifted tensors (dw = -1 / +1), column masks folded in once:
        xl = pltpu.roll(xn, shift=1, axis=1) * cm_l            # xl[p] = xn[p-1]  (col w-1)
        xr = pltpu.roll(xn, shift=HW - 1, axis=1) * cm_r       # xr[p] = xn[p+1]  (col w+1)

        # per-source-row weighted sums (pure VALU):
        row_u = xl * w_tl + xn * w_tc + xr * w_tr              # taps reading row h-1
        row_m = xl * w_ml + xn * w_mc + xr * w_mr              # taps reading row h
        row_d = xl * w_bl + xn * w_bc + xr * w_br              # taps reading row h+1

        conv = row_m + dwb
        conv = conv + pltpu.roll(row_u, shift=W, axis=1) * rm_u        # [p] <- row_u[p-W]
        conv = conv + pltpu.roll(row_d, shift=HW - W, axis=1) * rm_d   # [p] <- row_d[p+W]

        # ---- SE attention: global avg-pool -> 1x1 -> ReLU -> 1x1 -> sigmoid (no biases) ----
        pooled = jnp.mean(xn, axis=1, keepdims=True)                          # (C, 1)
        h = jnp.maximum(jnp.sum(pooled * fc1, axis=0, keepdims=True), 0.0)    # (1, C8)
        s = jax.nn.sigmoid(jnp.sum(h * fc2, axis=1, keepdims=True))           # (C, 1)

        # ---- fuse + residual ----
        o_ref[b] = (conv * (xn * s) + xf).astype(o_ref.dtype)

    if BN == 1:
        process_image(0)
    else:
        # Dynamic loop keeps vreg live ranges / code size bounded while packing many
        # images per grid step (amortizes the ~0.35us per-step overhead).
        def body(b, carry):
            process_image(b)
            return carry
        lax.fori_loop(0, BN, body, 0)


def _pick_images_per_step(n, per_image_bytes, *, max_unroll=64,
                          target_bytes=4 << 20, min_steps=2):
    """Images per grid step: amortize per-step overhead, keep the block well inside
    VMEM (double-buffered in+out), and keep grid >= min_steps so both TensorCores
    on v7x get work."""
    bn = min(n, max_unroll,
             max(1, target_bytes // max(per_image_bytes, 1)),
             max(1, n // min_steps))
    bn = max(int(bn), 1)
    while n % bn:
        bn -= 1
    return bn


@jax.jit
def msef_block(x, ln_w, ln_b, gamma, beta, dw_w, dw_b, fc1, fc2):
    """x: (N, C, H, W) float32 (NCHW, torch layout).  Returns (N, C, H, W).

    ln_w/ln_b: LayerNorm affine (C,);  gamma/beta: outer scale/shift (C,);
    dw_w: depthwise weight (C, 1, 3, 3);  dw_b: (C,);
    fc1: (C//8, C);  fc2: (C, C//8)   (1x1 conv weights, squeezed, bias=False).
    """
    N, C, H, W = x.shape
    HW = H * W
    C8 = fc1.shape[0]

    # Fold LayerNorm affine with the outer gamma/beta: ((xhat*w + b)*gamma + beta).
    ln_scale = (ln_w * gamma).reshape(C, 1)
    ln_bias = (ln_b * gamma + beta).reshape(C, 1)
    dww = dw_w.reshape(C, 9)                 # [c, kh*3+kw]
    dwb = dw_b.reshape(C, 1)

    # Pack all per-channel params into one slab -> single tiny DMA / BlockSpec.
    params = jnp.concatenate(
        [ln_scale, ln_bias, dww, dwb, fc1.T, fc2], axis=1).astype(jnp.float32)

    # Edge-validity masks of the zero-padded 3x3 conv, flattened over (H, W).
    wi = jnp.arange(W)
    hi = jnp.arange(H)
    cm_l = jnp.broadcast_to((wi >= 1)[None, :], (H, W)).reshape(HW)
    cm_r = jnp.broadcast_to((wi <= W - 2)[None, :], (H, W)).reshape(HW)
    rm_u = jnp.broadcast_to((hi >= 1)[:, None], (H, W)).reshape(HW)
    rm_d = jnp.broadcast_to((hi <= H - 2)[:, None], (H, W)).reshape(HW)
    mask4 = jnp.stack([cm_l, cm_r, rm_u, rm_d], axis=0).astype(jnp.float32)

    x2d = x.reshape(N, C, HW)                # NCHW -> lane-dense (C, H*W) per image
    bn = _pick_images_per_step(N, C * HW * x.dtype.itemsize)

    def img_map(n):
        return (n, 0, 0)

    def param_map(n):
        return (0, 0)

    # Note: HW must stay a multiple of 128 (it is the lane extent of each block) —
    # pad or tile rows (with +-1-row halos and re-derived masks) when generalizing.
    out = pl.pallas_call(
        functools.partial(msef_kernel, W=W, C8=C8),
        out_shape=jax.ShapeDtypeStruct((N, C, HW), x.dtype),
        grid_spec=pltpu.PrefetchScalarGridSpec(
            num_scalar_prefetch=0,
            grid=(N // bn,),
            in_specs=[
                pl.BlockSpec((bn, C, HW), img_map),        # x (lane-dense view)
                pl.BlockSpec(params.shape, param_map),     # packed per-channel params
                pl.BlockSpec((4, HW), param_map),          # conv edge masks
            ],
            out_specs=pl.BlockSpec((bn, C, HW), img_map),
        ),
        compiler_params=pltpu.CompilerParams(
            dimension_semantics=("parallel",),
            # Budgeted against v7x's 64 MiB physical VMEM; blocks here are tiny.
            vmem_limit_bytes=32 * 1024 * 1024,
        ),
    )(x2d, params, mask4)
    return out.reshape(N, C, H, W)


def msef_reference(x, ln_w, ln_b, gamma, beta, dw_w, dw_b, fc1, fc2):
    """Pure-JAX NCHW reference mirroring the PyTorch forward."""
    N, C, H, W = x.shape
    mu = jnp.mean(x, axis=1, keepdims=True)
    var = jnp.mean((x - mu) ** 2, axis=1, keepdims=True)
    xn = (x - mu) / jnp.sqrt(var + LN_EPS)
    xn = xn * ln_w.reshape(1, C, 1, 1) + ln_b.reshape(1, C, 1, 1)
    xn = xn * gamma.reshape(1, C, 1, 1) + beta.reshape(1, C, 1, 1)

    xp = jnp.pad(xn, ((0, 0), (0, 0), (1, 1), (1, 1)))
    conv = jnp.zeros_like(xn) + dw_b.reshape(1, C, 1, 1)
    for kh in range(3):
        for kw in range(3):
            conv = conv + xp[:, :, kh:kh + H, kw:kw + W] * dw_w[:, 0, kh, kw].reshape(1, C, 1, 1)

    pooled = jnp.mean(xn, axis=(2, 3))                       # (N, C)
    h = jnp.maximum(pooled @ fc1.T, 0.0)                     # (N, C8)
    s = jax.nn.sigmoid(h @ fc2.T)                            # (N, C)
    return conv * (xn * s[:, :, None, None]) + x


if __name__ == "__main__":
    key = jax.random.PRNGKey(0)
    N, C, H, W = 2, 16, 16, 16          # filters=16 so channels//8 = 2
    C8 = C // 8
    ks = jax.random.split(key, 8)

    x = jax.random.normal(ks[0], (N, C, H, W), jnp.float32)

    # LayerNormalization params (randomized to exercise the affine folding).
    ln_w = 1.0 + 0.1 * jax.random.normal(ks[1], (C,), jnp.float32)
    ln_b = 0.1 * jax.random.normal(ks[2], (C,), jnp.float32)
    gamma = 1.0 + 0.1 * jax.random.normal(ks[3], (C,), jnp.float32)
    beta = 0.1 * jax.random.normal(ks[4], (C,), jnp.float32)

    # Depthwise conv: torch shape (C, 1, 3, 3), kaiming_uniform fan_in=9 relu; bias=0.
    bound = (2.0 ** 0.5) * (3.0 / 9.0) ** 0.5
    dw_w = jax.random.uniform(ks[5], (C, 1, 3, 3), jnp.float32, -bound, bound)
    dw_b = jnp.zeros((C,), jnp.float32)

    # SE 1x1 convs: kaiming_normal fan_in, relu gain, bias=False (matches nn.Conv2d(..., bias=False)).
    fc1 = jax.random.normal(ks[6], (C8, C), jnp.float32) * (2.0 / C) ** 0.5
    fc2 = jax.random.normal(ks[7], (C, C8), jnp.float32) * (2.0 / C8) ** 0.5

    out = jax.block_until_ready(
        msef_block(x, ln_w, ln_b, gamma, beta, dw_w, dw_b, fc1, fc2))
    ref = msef_reference(x, ln_w, ln_b, gamma, beta, dw_w, dw_b, fc1, fc2)
    err = float(jnp.max(jnp.abs(out - ref)))
    assert jnp.allclose(out, ref, atol=1e-4, rtol=1e-4), f"max abs err {err}"
    print("KERNEL_OK")
</pallas_src>

<mosaic_0001>
module attributes {stable_mosaic.version = 11 : i64} {
  func.func @msef_kernel(%arg0: i32, %arg1: memref<1x16x256xf32, #tpu.memory_space<vmem>>, %arg2: memref<16x16xf32, #tpu.memory_space<vmem>>, %arg3: memref<4x256xf32, #tpu.memory_space<vmem>>, %arg4: memref<1x16x256xf32, #tpu.memory_space<vmem>>) attributes {dimension_semantics = [#tpu.dimension_semantics<parallel>], iteration_bounds = array<i64: 2>, scalar_prefetch = 0 : i64, scratch_operands = 0 : i64, tpu.core_type = #tpu.core_type<tc>, window_params = [{transform_indices = @transform_0, window_bounds = array<i64: 1, 16, 256>}, {pipeline_mode = #tpu.pipeline_mode<synchronous>, transform_indices = @transform_1, window_bounds = array<i64: 16, 16>}, {pipeline_mode = #tpu.pipeline_mode<synchronous>, transform_indices = @transform_2, window_bounds = array<i64: 4, 256>}, {transform_indices = @transform_3, window_bounds = array<i64: 1, 16, 256>}]} {
    %c0 = arith.constant 0 : index
    %c0_0 = arith.constant 0 : index
    %0 = vector.load %arg2[%c0, %c0_0] : memref<16x16xf32, #tpu.memory_space<vmem>>, vector<16x16xf32>
    %1 = vector.extract_strided_slice %0 {offsets = [0, 0], sizes = [16, 1], strides = [1, 1]} : vector<16x16xf32> to vector<16x1xf32>
    %2 = vector.extract_strided_slice %0 {offsets = [0, 1], sizes = [16, 1], strides = [1, 1]} : vector<16x16xf32> to vector<16x1xf32>
    %3 = vector.extract_strided_slice %0 {offsets = [0, 2], sizes = [16, 9], strides = [1, 1]} : vector<16x16xf32> to vector<16x9xf32>
    %4 = vector.extract_strided_slice %0 {offsets = [0, 11], sizes = [16, 1], strides = [1, 1]} : vector<16x16xf32> to vector<16x1xf32>
    %5 = vector.extract_strided_slice %0 {offsets = [0, 12], sizes = [16, 2], strides = [1, 1]} : vector<16x16xf32> to vector<16x2xf32>
    %6 = vector.extract_strided_slice %0 {offsets = [0, 14], sizes = [16, 2], strides = [1, 1]} : vector<16x16xf32> to vector<16x2xf32>
    %7 = vector.extract_strided_slice %3 {offsets = [0, 0], sizes = [16, 1], strides = [1, 1]} : vector<16x9xf32> to vector<16x1xf32>
    %8 = vector.extract_strided_slice %3 {offsets = [0, 1], sizes = [16, 1], strides = [1, 1]} : vector<16x9xf32> to vector<16x1xf32>
    %9 = vector.extract_strided_slice %3 {offsets = [0, 2], sizes = [16, 1], strides = [1, 1]} : vector<16x9xf32> to vector<16x1xf32>
    %10 = vector.extract_strided_slice %3 {offsets = [0, 3], sizes = [16, 1], strides = [1, 1]} : vector<16x9xf32> to vector<16x1xf32>
    %11 = vector.extract_strided_slice %3 {offsets = [0, 4], sizes = [16, 1], strides = [1, 1]} : vector<16x9xf32> to vector<16x1xf32>
    %12 = vector.extract_strided_slice %3 {offsets = [0, 5], sizes = [16, 1], strides = [1, 1]} : vector<16x9xf32> to vector<16x1xf32>
    %13 = vector.extract_strided_slice %3 {offsets = [0, 6], sizes = [16, 1], strides = [1, 1]} : vector<16x9xf32> to vector<16x1xf32>
    %14 = vector.extract_strided_slice %3 {offsets = [0, 7], sizes = [16, 1], strides = [1, 1]} : vector<16x9xf32> to vector<16x1xf32>
    %15 = vector.extract_strided_slice %3 {offsets = [0, 8], sizes = [16, 1], strides = [1, 1]} : vector<16x9xf32> to vector<16x1xf32>
    %c0_1 = arith.constant 0 : index
    %c0_2 = arith.constant 0 : index
    %16 = vector.load %arg3[%c0_1, %c0_2] : memref<4x256xf32, #tpu.memory_space<vmem>>, vector<1x256xf32>
    %c1 = arith.constant 1 : index
    %c0_3 = arith.constant 0 : index
    %17 = vector.load %arg3[%c1, %c0_3] : memref<4x256xf32, #tpu.memory_space<vmem>>, vector<1x256xf32>
    %c2 = arith.constant 2 : index
    %c0_4 = arith.constant 0 : index
    %18 = vector.load %arg3[%c2, %c0_4] : memref<4x256xf32, #tpu.memory_space<vmem>>, vector<1x256xf32>
    %c3 = arith.constant 3 : index
    %c0_5 = arith.constant 0 : index
    %19 = vector.load %arg3[%c3, %c0_5] : memref<4x256xf32, #tpu.memory_space<vmem>>, vector<1x256xf32>
    %c0_6 = arith.constant 0 : index
    %c0_7 = arith.constant 0 : index
    %c0_8 = arith.constant 0 : index
    %20 = vector.load %arg1[%c0_6, %c0_7, %c0_8] : memref<1x16x256xf32, #tpu.memory_space<vmem>>, vector<1x16x256xf32>
    %21 = vector.shape_cast %20 : vector<1x16x256xf32> to vector<16x256xf32>
    %cst = arith.constant dense<0.000000e+00> : vector<256xf32>
    %22 = vector.multi_reduction <add>, %21, %cst [0] : vector<16x256xf32> to vector<256xf32>
    %23 = vector.shape_cast %22 : vector<256xf32> to vector<1x256xf32>
    %cst_9 = arith.constant 6.250000e-02 : f32
    %24 = vector.broadcast %cst_9 : f32 to vector<1x256xf32>
    %25 = arith.mulf %23, %24 : vector<1x256xf32>
    %26 = arith.mulf %21, %21 : vector<16x256xf32>
    %cst_10 = arith.constant dense<0.000000e+00> : vector<256xf32>
    %27 = vector.multi_reduction <add>, %26, %cst_10 [0] : vector<16x256xf32> to vector<256xf32>
    %28 = vector.shape_cast %27 : vector<256xf32> to vector<1x256xf32>
    %cst_11 = arith.constant 6.250000e-02 : f32
    %29 = vector.broadcast %cst_11 : f32 to vector<1x256xf32>
    %30 = arith.mulf %28, %29 : vector<1x256xf32>
    %31 = arith.mulf %25, %25 : vector<1x256xf32>
    %32 = arith.subf %30, %31 : vector<1x256xf32>
    %33 = vector.broadcast %25 : vector<1x256xf32> to vector<16x256xf32>
    %34 = arith.subf %21, %33 : vector<16x256xf32>
    %cst_12 = arith.constant 9.99999974E-6 : f32
    %35 = vector.broadcast %cst_12 : f32 to vector<1x256xf32>
    %36 = arith.addf %32, %35 : vector<1x256xf32>
    %37 = math.rsqrt %36 : vector<1x256xf32>
    %38 = vector.broadcast %37 : vector<1x256xf32> to vector<16x256xf32>
    %39 = arith.mulf %34, %38 : vector<16x256xf32>
    %40 = vector.broadcast %1 : vector<16x1xf32> to vector<16x256xf32>
    %41 = arith.mulf %39, %40 : vector<16x256xf32>
    %42 = vector.broadcast %2 : vector<16x1xf32> to vector<16x256xf32>
    %43 = arith.addf %41, %42 : vector<16x256xf32>
    %c1_i32 = arith.constant 1 : i32
    %44 = tpu.dynamic_rotate %43 by %c1_i32 dim 1 : vector<16x256xf32>, i32 -> vector<16x256xf32>
    %45 = vector.broadcast %16 : vector<1x256xf32> to vector<16x256xf32>
    %46 = arith.mulf %44, %45 : vector<16x256xf32>
    %c255_i32 = arith.constant 255 : i32
    %47 = tpu.dynamic_rotate %43 by %c255_i32 dim 1 : vector<16x256xf32>, i32 -> vector<16x256xf32>
    %48 = vector.broadcast %17 : vector<1x256xf32> to vector<16x256xf32>
    %49 = arith.mulf %47, %48 : vector<16x256xf32>
    %50 = vector.broadcast %7 : vector<16x1xf32> to vector<16x256xf32>
    %51 = arith.mulf %46, %50 : vector<16x256xf32>
    %52 = vector.broadcast %8 : vector<16x1xf32> to vector<16x256xf32>
    %53 = arith.mulf %43, %52 : vector<16x256xf32>
    %54 = arith.addf %51, %53 : vector<16x256xf32>
    %55 = vector.broadcast %9 : vector<16x1xf32> to vector<16x256xf32>
    %56 = arith.mulf %49, %55 : vector<16x256xf32>
    %57 = arith.addf %54, %56 : vector<16x256xf32>
    %58 = vector.broadcast %10 : vector<16x1xf32> to vector<16x256xf32>
    %59 = arith.mulf %46, %58 : vector<16x256xf32>
    %60 = vector.broadcast %11 : vector<16x1xf32> to vector<16x256xf32>
    %61 = arith.mulf %43, %60 : vector<16x256xf32>
    %62 = arith.addf %59, %61 : vector<16x256xf32>
    %63 = vector.broadcast %12 : vector<16x1xf32> to vector<16x256xf32>
    %64 = arith.mulf %49, %63 : vector<16x256xf32>
    %65 = arith.addf %62, %64 : vector<16x256xf32>
    %66 = vector.broadcast %13 : vector<16x1xf32> to vector<16x256xf32>
    %67 = arith.mulf %46, %66 : vector<16x256xf32>
    %68 = vector.broadcast %14 : vector<16x1xf32> to vector<16x256xf32>
    %69 = arith.mulf %43, %68 : vector<16x256xf32>
    %70 = arith.addf %67, %69 : vector<16x256xf32>
    %71 = vector.broadcast %15 : vector<16x1xf32> to vector<16x256xf32>
    %72 = arith.mulf %49, %71 : vector<16x256xf32>
    %73 = arith.addf %70, %72 : vector<16x256xf32>
    %74 = vector.broadcast %4 : vector<16x1xf32> to vector<16x256xf32>
    %75 = arith.addf %65, %74 : vector<16x256xf32>
    %c16_i32 = arith.constant 16 : i32
    %76 = tpu.dynamic_rotate %57 by %c16_i32 dim 1 : vector<16x256xf32>, i32 -> vector<16x256xf32>
    %77 = vector.broadcast %18 : vector<1x256xf32> to vector<16x256xf32>
    %78 = arith.mulf %76, %77 : vector<16x256xf32>
    %79 = arith.addf %75, %78 : vector<16x256xf32>
    %c240_i32 = arith.constant 240 : i32
    %80 = tpu.dynamic_rotate %73 by %c240_i32 dim 1 : vector<16x256xf32>, i32 -> vector<16x256xf32>
    %81 = vector.broadcast %19 : vector<1x256xf32> to vector<16x256xf32>
    %82 = arith.mulf %80, %81 : vector<16x256xf32>
    %83 = arith.addf %79, %82 : vector<16x256xf32>
    %cst_13 = arith.constant dense<0.000000e+00> : vector<16xf32>
    %84 = vector.multi_reduction <add>, %43, %cst_13 [1] : vector<16x256xf32> to vector<16xf32>
    %85 = vector.shape_cast %84 : vector<16xf32> to vector<16x1xf32>
    %cst_14 = arith.constant 2.560000e+02 : f32
    %86 = vector.broadcast %cst_14 : f32 to vector<16x1xf32>
    %87 = arith.divf %85, %86 : vector<16x1xf32>
    %88 = vector.broadcast %87 : vector<16x1xf32> to vector<16x2xf32>
    %89 = arith.mulf %88, %5 : vector<16x2xf32>
    %cst_15 = arith.constant dense<0.000000e+00> : vector<2xf32>
    %90 = vector.multi_reduction <add>, %89, %cst_15 [0] : vector<16x2xf32> to vector<2xf32>
    %91 = vector.shape_cast %90 : vector<2xf32> to vector<1x2xf32>
    %cst_16 = arith.constant 0.000000e+00 : f32
    %92 = vector.broadcast %cst_16 : f32 to vector<1x2xf32>
    %93 = arith.maximumf %91, %92 : vector<1x2xf32>
    %94 = vector.broadcast %93 : vector<1x2xf32> to vector<16x2xf32>
    %95 = arith.mulf %94, %6 : vector<16x2xf32>
    %cst_17 = arith.constant dense<0.000000e+00> : vector<16xf32>
    %96 = vector.multi_reduction <add>, %95, %cst_17 [1] : vector<16x2xf32> to vector<16xf32>
    %97 = vector.shape_cast %96 : vector<16xf32> to vector<16x1xf32>
    %98 = arith.negf %97 : vector<16x1xf32>
    %99 = math.exp %98 : vector<16x1xf32>
    %cst_18 = arith.constant 1.000000e+00 : f32
    %100 = vector.broadcast %cst_18 : f32 to vector<16x1xf32>
    %101 = arith.addf %100, %99 : vector<16x1xf32>
    %102 = arith.divf %100, %101 : vector<16x1xf32>
    %103 = vector.broadcast %102 : vector<16x1xf32> to vector<16x256xf32>
    %104 = arith.mulf %43, %103 : vector<16x256xf32>
    %105 = arith.mulf %83, %104 : vector<16x256xf32>
    %106 = arith.addf %105, %21 : vector<16x256xf32>
    %c0_19 = arith.constant 0 : index
    %c0_20 = arith.constant 0 : index
    %c0_21 = arith.constant 0 : index
    %107 = vector.load %arg4[%c0_19, %c0_20, %c0_21] : memref<1x16x256xf32, #tpu.memory_space<vmem>>, vector<1x16x256xf32>
    %108 = vector.shape_cast %107 : vector<1x16x256xf32> to vector<16x256xf32>
    %109 = vector.shape_cast %106 : vector<16x256xf32> to vector<1x16x256xf32>
    tpu.vector_store %arg4[%c0_19, %c0_20, %c0_21], %109 {strides = array<i32>} : memref<1x16x256xf32, #tpu.memory_space<vmem>>, vector<1x16x256xf32>,
    return
  }
  func.func @transform_0(%arg0: i32) -> (i32, i32, i32) {
    %c0_i32 = arith.constant 0 : i32
    %c0_i32_0 = arith.constant 0 : i32
    %c0_i32_1 = arith.constant 0 : i32
    return %arg0, %c0_i32, %c0_i32_0 : i32, i32, i32
  }
  func.func @transform_1(%arg0: i32) -> (i32, i32) {
    %c0_i32 = arith.constant 0 : i32
    %c0_i32_0 = arith.constant 0 : i32
    %c0_i32_1 = arith.constant 0 : i32
    return %c0_i32, %c0_i32_0 : i32, i32
  }
  func.func @transform_2(%arg0: i32) -> (i32, i32) {
    %c0_i32 = arith.constant 0 : i32
    %c0_i32_0 = arith.constant 0 : i32
    %c0_i32_1 = arith.constant 0 : i32
    return %c0_i32, %c0_i32_0 : i32, i32
  }
  func.func @transform_3(%arg0: i32) -> (i32, i32, i32) {
    %c0_i32 = arith.constant 0 : i32
    %c0_i32_0 = arith.constant 0 : i32
    %c0_i32_1 = arith.constant 0 : i32
    return %arg0, %c0_i32, %c0_i32_0 : i32, i32, i32
  }
}

</mosaic_0001>

<bundles_post_ra>
// kernel: msef_block.1
= control target key start
LH: loop header
LB: loop body
LE: loop exit
PB: predicated region body
PF: predicated region fallthrough
CT: control target
= control target key end

     0   :  { %s808_s12 = smov 0   ;;  %s1083_s0 = inlined_call_operand.vmem [shape: f32[2,16,256], index: 0, kind: input, shape index: {}]   ;;  %s1084_s1 = inlined_call_operand.vmem [shape: f32[16,16], index: 1, kind: input, shape index: {}]   ;;  %s1085_s2 = inlined_call_operand.vmem [shape: f32[4,256], index: 2, kind: input, shape index: {}]   ;;  %s1086_s3 = inlined_call_operand.vmem [shape: f32[2,16,256], index: 3, kind: output, shape index: {}]  }
   0x1 LB: > { %s682_s13 = sadd.s32 4294967295, %s767_s12   ;;  %p686_p0 = scmp.ge.s32.totalorder %s767_s12, 1  ;;  %s767_s12 = sphi %s808_s12, %s13_s12  }
   0x2   : > { %p137_p1 = scmp.lt.s32.totalorder %s767_s12, 3 }
   0x4   : > { %p138_p2 = pnand %p686_p0, %p137_p1 }
   0x5   : > { %p161_p3 = scmp.lt.s32.totalorder (!%p138_p2), %s682_s13, 1  ;;  %s776_s18 = smov (!%p138_p2), 126  }
   0x6   : > { %141 = sbr.rel (%p138_p2) target bundleno = 607 (0x25f), region = 32  ;;  %s779_s23 = smov (!%p138_p2), 1  }
   0x7   : > { %s780_s24 = smov (!%p138_p2), 127   ;;  %s783_s29 = smov (!%p138_p2), 16  }
   0x8   : > { %s785_s30 = smov (!%p138_p2), 116   ;;  %s786_s4 = smov (!%p138_p2), 112  }
   0xb   : > { %v819_v0 = vld [vmem:[%s1084_s1] sm:$0xff]  ;;  %v769_v1 = vmov 1   ;;  %v770_v2 = vmov 0   ;;  %v771_v3 = vmov 3   ;;  %v827_v4 = vld [vmem:[%s1084_s1 + $0x8] sm:$0xff]  ;;  %v772_v5 = vmov 4  }
   0xc   : > { %728 = vset.pattern.permute.xlu1 %v769_v1  ;;  %727 = vset.pattern.permute.xlu0 %v770_v2  ;;  %v773_v6 = vmov 2   ;;  %v774_v7 = vmov 6   ;;  %v775_v8 = vmov 5   ;;  %s1088_s13 = smov (!%p161_p3, %s682_s13), 1  ;;  %v777_v51 = vmov 8  }
   0xd   : > { %269 = vperm.xlu1 %728, %v819_v0   ;;  %256 = vperm.xlu0 %727, %v819_v0   ;;  %s698_s19 = sshll.u32 %s1088_s13, 5  ;;  %v778_v58 = vmov 7   ;;  %vm539_vm9 = vcmask 113760   ;;  %vm566_vm10 = vcmask 15360  }
   0xe   : > { %731 = vset.pattern.permute.xlu2 %v771_v3  ;;  %s165_s22 = scalar_lea.vmem %s1083_s0, %s698_s19  ;;  %s170_s11 = scalar_lea.vmem %s1086_s3, %s698_s19 }
   0xf   : > { %339 = vperm.xlu2 %731, %v819_v0   ;;  %v851_v9 = vld [vmem:[%s165_s22] sm:$0xff]  ;;  %v853_v10 = vld [vmem:[%s165_s22 + $0x8] sm:$0xff]  ;;  %v855_v11 = vld [vmem:[%s165_s22 + $0x10] sm:$0xff] }
  0x10   : > { %v857_v12 = vld [vmem:[%s165_s22 + $0x18] sm:$0xff]  ;;  %v184_v13 = vadd.f32 %v855_v11, %v851_v9  ;;  %v200_v14 = vmul.f32 %v851_v9, %v851_v9  ;;  %v201_v15 = vmul.f32 %v853_v10, %v853_v10  ;;  %v202_v16 = vmul.f32 %v855_v11, %v855_v11 }
  0x11   : > { %v191_v17 = vadd.f32 %v857_v12, %v853_v10  ;;  %v203_v18 = vmul.f32 %v857_v12, %v857_v12 }
  0x12   : > { %v185_v19 = vrot.slane %v184_v13, 4  ;;  %v204_v20 = vadd.f32 %v202_v16, %v200_v14 }
  0x13   : > { %v192_v21 = vrot.slane %v191_v17, 4  ;;  %v211_v22 = vadd.f32 %v203_v18, %v201_v15 }
  0x14   : > { %v186_v23 = vadd.f32 %v185_v19, %v184_v13  ;;  %v205_v24 = vrot.slane %v204_v20, 4 }
  0x15   : > { %273 = vperm.xlu1 %728, %v827_v4   ;;  %261 = vperm.xlu0 %727, %v827_v4   ;;  %v193_v25 = vadd.f32 %v192_v21, %v191_v17  ;;  %v212_v26 = vrot.slane %v211_v22, 4 }
  0x16   : > { %v187_v27 = vrot.slane %v186_v23, 2  ;;  %v206_v28 = vadd.f32 %v205_v24, %v204_v20 }
  0x17   : > { %734 = vset.pattern.permute.xlu2 %v772_v5  ;;  %v194_v29 = vrot.slane %v193_v25, 2  ;;  %v213_v30 = vadd.f32 %v212_v26, %v211_v22 }
  0x18   : > { %359 = vperm.xlu2 %734, %v827_v4   ;;  %v188_v31 = vadd.f32 %v187_v27, %v186_v23  ;;  %v207_v32 = vrot.slane %v206_v28, 2 }
  0x19   : > { %v195_v33 = vadd.f32 %v194_v29, %v193_v25  ;;  %v214_v34 = vrot.slane %v213_v30, 2 }
  0x1a   : > { %v189_v35 = vrot.slane %v188_v31, 1  ;;  %v208_v36 = vadd.f32 %v207_v32, %v206_v28 }
  0x1b   : > { %v196_v37 = vrot.slane %v195_v33, 1  ;;  %v215_v38 = vadd.f32 %v214_v34, %v213_v30 }
  0x1c   : > { %v190_v39 = vadd.f32 %v189_v35, %v188_v31  ;;  %v209_v40 = vrot.slane %v208_v36, 1 }
  0x1d   : > { %729 = vset.pattern.permute.xlu0 %v773_v6  ;;  %730 = vset.pattern.permute.xlu1 %v773_v6  ;;  %v197_v41 = vadd.f32 %v196_v37, %v195_v33  ;;  %v216_v42 = vrot.slane %v215_v38, 1  ;;  %v781_v33 = vmov 9  }
  0x1e   : > { %327 = vperm.xlu0 %729, %v819_v0   ;;  %331 = vperm.xlu1 %730, %v827_v4   ;;  %v198_v43 = vmul.f32 0.0625, %v190_v39  ;;  %v210_v44 = vadd.f32 %v209_v40, %v208_v36 }
  0x1f   : > { %v199_v45 = vmul.f32 0.0625, %v197_v41  ;;  %v217_v46 = vadd.f32 %v216_v42, %v215_v38  ;;  %v782_v38 = vmov 10  }
  0x20   : > { %737 = vset.pattern.permute.xlu2 %v774_v7  ;;  %v218_v47 = vmul.f32 0.0625, %v210_v44  ;;  %v220_v48 = vmul.f32 %v198_v43, %v198_v43  ;;  %v224_v7 = vsub.f32 %v851_v9, %v198_v43  ;;  %v226_v21 = vsub.f32 %v855_v11, %v198_v43 }
  0x21   : > { %383 = vperm.xlu2 %737, %v819_v0   ;;  %v219_v49 = vmul.f32 0.0625, %v217_v46  ;;  %v221_v50 = vmul.f32 %v199_v45, %v199_v45  ;;  %v227_v22 = vsub.f32 %v857_v12, %v199_v45 }
  0x22   : > { %v222_v52 = vsub.f32 %v218_v47, %v220_v48 }
  0x23   : > { %v223_v53 = vsub.f32 %v219_v49, %v221_v50 }
  0x24   : > { %v228_v54 = vadd.f32 1e-05, %v222_v52  ;;  %v288_v52 = vlaneseq }
  0x25   : > { %v229_v55 = vadd.f32 1e-05, %v223_v53 }
  0x26   : > { %732 = vset.pattern.permute.xlu0 %v771_v3  ;;  %735 = vset.pattern.permute.xlu1 %v775_v8  ;;  %747 = vrsqrt.f32 %v228_v54  ;;  %vm236_vm0 = vweird.f32 %v228_v54  ;;  %v921_v53 = vand.u32 127, %v288_v52 }
  0x27   : > { %343 = vperm.xlu0 %732, %v827_v4   ;;  %371 = vperm.xlu1 %735, %v819_v0   ;;  %749 = vrsqrt.f32 %v229_v55  ;;  %vm246_vm2 = vweird.f32 %v229_v55 }
  0x28   : > { %vm290_vm6 = vcmp.lt.s32.totalorder %v921_v53, 1  ;;  %vm312_vm7 = vcmp.lt.s32.totalorder %v921_v53, 127  ;;  %vm478_vm11 = vcmp.lt.s32.totalorder %v921_v53, 16  ;;  %vm504_vm12 = vcmp.lt.s32.totalorder %v921_v53, 112 }
  0x29   : > { %387 = vperm.xlu2 %737, %v827_v4  }
  0x2c   : > { %v748_v56 = vpop.eup %747 }
  0x2d   : > { %v750_v57 = vpop.eup %749  ;;  %v231_v59 = vmul.f32 %v748_v56, %v228_v54  ;;  %vm237_vm1 = vweird.f32 %v748_v56  ;;  %v173_v54 = vld [vmem:[%s1085_s2] ss:$4 sm:$0x3] }
  0x2e   : > { %v241_v60 = vmul.f32 %v750_v57, %v229_v55  ;;  %vm247_vm3 = vweird.f32 %v750_v57  ;;  %vm238_vm4 = vmor %vm236_vm0, %vm237_vm1 }
  0x2f   : > { %550 = vrot.lane.b32.xlu0 %v819_v0, %s776_s18  ;;  %738 = vset.pattern.permute.xlu1 %v778_v58  ;;  %v232_v61 = vmul.f32 %v748_v56, %v231_v59  ;;  %vm248_vm5 = vmor %vm246_vm2, %vm247_vm3  ;;  %v297_v59 = vperm.slane %v173_v54, 1 }
  0x30   : > { %733 = vset.pattern.permute.xlu0 %v772_v5  ;;  %399 = vperm.xlu1 %738, %v819_v0   ;;  %v242_v62 = vmul.f32 %v750_v57, %v241_v60 }
  0x31   : > { %740 = vset.pattern.permute.xlu2 %v777_v51  ;;  %v233_v63 = vmul.f32 0.5, %v232_v61 }
  0x32   : > { %v243_v1 = vmul.f32 0.5, %v242_v62 }
  0x33   : > { %v234_v2 = vsub.f32 1.5, %v233_v63 }
  0x34   : > { %v244_v3 = vsub.f32 1.5, %v243_v1 }
  0x35   : > { %v235_v5 = vmul.f32 %v748_v56, %v234_v2  ;;  %v691_v2 = vld [vmem:[%s1085_s2 + $0x1] ss:$4 sm:$0x3] }
  0x36   : > { %v245_v6 = vmul.f32 %v750_v57, %v244_v3 }
  0x37   : > { %552 = vrot.lane.b32.xlu0 %v827_v4, %s776_s18  ;;  %v239_v13 = vsel %vm238_vm4, %v748_v56, %v235_v5 }
  0x38   : > { %v249_v14 = vsel %vm248_vm5, %v750_v57, %v245_v6  ;;  %v250_v15 = vmul.f32 %v239_v13, %v224_v7  ;;  %v252_v25 = vmul.f32 %v239_v13, %v226_v21  ;;  %741 = vset.pattern.permute.xlu1 %v781_v33  ;;  %v296_v57 = vperm.slane %v173_v54, 0 }
  0x39   : > { %v253_v26 = vmul.f32 %v249_v14, %v227_v22 }
  0x3f   : > { %355 = vperm.xlu0 %733, %v819_v0  }
  0x47   : > { %736 = vset.pattern.permute.xlu0 %v775_v8  ;;  %v225_v8 = vsub.f32 %v853_v10, %v199_v45 }
  0x48   : > { %375 = vperm.xlu0 %736, %v827_v4  }
  0x49   : > { %v251_v16 = vmul.f32 %v249_v14, %v225_v8  ;;  %v318_v14 = vperm.slane %v691_v2, 0 }
  0x50   : > { %739 = vset.pattern.permute.xlu0 %v777_v51 }
  0x51   : > { %415 = vperm.xlu0 %739, %v819_v0  }
  0x59   : > { %744 = vset.pattern.permute.xlu0 %v782_v38 }
  0x69   : > { %v899_v35 = vpop.permute.xlu2 %339 }
  0x72   : > { %v905_v39 = vpop.permute.xlu2 %359 }
  0x7b   : > { %v384_v42 = vpop.permute.xlu2 %383 }
  0x7f   : > { %v270_v17 = vpop.permute.xlu1 %269  ;;  %v257_v18 = vpop.permute.xlu0 %256 }
  0x80   : > { %v264_v19 = vmul.f32 %v257_v18, %v250_v15  ;;  %v265_v20 = vmul.f32 %v257_v18, %v251_v16 }
  0x82   : > { %v881_v23 = vadd.f32 %v270_v17, %v264_v19  ;;  %v883_v24 = vadd.f32 %v270_v17, %v265_v20  ;;  %v319_v17 = vperm.slane %v691_v2, 1 }
  0x83   : > { %v913_v44 = vpop.permute.xlu2 %387 }
  0x84   : > { %284 = vrot.lane.b32.xlu0 %v883_v24, %s779_s23  ;;  %280 = vrot.lane.b32.xlu2 %v881_v23, %s779_s23  ;;  %v522_v37 = vadd.f32 %v883_v24, %v881_v23  ;;  %v390_v3 = vmul.f32 %v384_v42, %v881_v23  ;;  %v391_v5 = vmul.f32 %v384_v42, %v883_v24 }
  0x85   : > { %v346_v13 = vmul.f32 %v899_v35, %v881_v23 }
  0x87   : > { %v262_v27 = vpop.permute.xlu0 %261  ;;  %v274_v30 = vpop.permute.xlu1 %273 }
  0x88   : > { %v266_v28 = vmul.f32 %v262_v27, %v252_v25  ;;  %v267_v29 = vmul.f32 %v262_v27, %v253_v26 }
  0x8a   : > { %v887_v31 = vadd.f32 %v274_v30, %v266_v28  ;;  %v889_v32 = vadd.f32 %v274_v30, %v267_v29 }
  0x8c   : > { %286 = vrot.lane.b32.xlu1 %v889_v32, %s779_s23  ;;  %306 = vrot.lane.b32.xlu0 %v887_v31, %s780_s24  ;;  %v525_v40 = vadd.f32 %v889_v32, %v887_v31 }
  0x8d   : > { %282 = vrot.lane.b32.xlu2 %v887_v31, %s779_s23 }
  0x90   : > { %v897_v34 = vpop.permute.xlu0 %327  ;;  %v332_v47 = vpop.permute.xlu1 %331 }
  0x94   : > { %308 = vrot.lane.b32.xlu1 %v883_v24, %s780_s24 }
  0x95   : > { %304 = vrot.lane.b32.xlu2 %v881_v23, %s780_s24 }
  0x99   : > { %v901_v36 = vpop.permute.xlu0 %343  ;;  %v372_v50 = vpop.permute.xlu1 %371 }
  0x9a   : > { %v349_v42 = vmul.f32 %v901_v36, %v889_v32 }
  0x9d   : > { %310 = vrot.lane.b32.xlu2 %v889_v32, %s780_s24 }
  0xa1   : > { %v909_v41 = vpop.permute.xlu0 %550 }
  0xa2   : > { %v400_v56 = vpop.permute.xlu1 %399 }
  0xa9   : > { %v911_v43 = vpop.permute.xlu0 %552 }
  0xb1   : > { %v916_v45 = vpop.permute.xlu0 %355 }
  0xba   : > { %v376_v48 = vpop.permute.xlu0 %375 }
  0xbe   : > { %523 = vadd.xlane.f32.xlu1 %v522_v37 }
  0xc3   : > { %v416_v51 = vpop.permute.xlu0 %415 }
  0xc6   : > { %526 = vadd.xlane.f32.xlu2 %v525_v40  ;;  %v348_v40 = vmul.f32 %v901_v36, %v887_v31 }
  0xd7   : > { %427 = vperm.xlu1 %741, %v819_v0  }
  0xde   : > { %419 = vperm.xlu2 %740, %v827_v4   ;;  %v281_v46 = vpop.permute.xlu2 %280 }
  0xdf   : > { %743 = vset.pattern.permute.xlu1 %v782_v38 }
  0xe0   : > { %443 = vperm.xlu1 %743, %v819_v0  }
  0xe6   : > { %742 = vset.pattern.permute.xlu2 %v781_v33 }
  0xe7   : > { %431 = vperm.xlu2 %742, %v827_v4   ;;  %v283_v49 = vpop.permute.xlu2 %282 }
  0xef   : > { %v305_v55 = vpop.permute.xlu2 %304 }
  0xf6   : > { %v285_v60 = vpop.permute.xlu0 %284 }
  0xf7   : > { %v291_v61 = vsel %vm290_vm6, %v281_v46, %v285_v60  ;;  %v293_v62 = vsel %vm290_vm6, %v285_v60, %v281_v46  ;;  %v311_v21 = vpop.permute.xlu2 %310 }
  0xf8   : > { %v300_v63 = vmul.f32 %v296_v57, %v293_v62  ;;  %v301_v1 = vmul.f32 %v297_v59, %v291_v61  ;;  %v347_v62 = vmul.f32 %v899_v35, %v883_v24 }
  0xfa   : > { %v334_v6 = vmul.f32 %v897_v34, %v300_v63  ;;  %v378_v7 = vmul.f32 %v372_v50, %v300_v63  ;;  %v379_v8 = vmul.f32 %v372_v50, %v301_v1  ;;  %v940_v15 = vmul.f32 %v416_v51, %v300_v63 }
  0xfb   : > { %v942_v16 = vmul.f32 %v416_v51, %v301_v1 }
  0xfc   : > { %v944_v18 = vadd.f32 %v346_v13, %v334_v6  ;;  %v394_v19 = vadd.f32 %v390_v3, %v378_v7  ;;  %v395_v20 = vadd.f32 %v391_v5, %v379_v8 }
  0xfe   : > { %v287_v22 = vpop.permute.xlu1 %286  ;;  %v307_v25 = vpop.permute.xlu0 %306 }
  0xff   : > { %v292_v26 = vsel %vm290_vm6, %v283_v49, %v287_v22  ;;  %v294_v27 = vsel %vm290_vm6, %v287_v22, %v283_v49  ;;  %v314_v28 = vsel %vm312_vm7, %v307_v25, %v311_v21  ;;  %v316_v29 = vsel %vm312_vm7, %v311_v21, %v307_v25 }
 0x100   : > { %v954_v30 = vmul.f32 %v296_v57, %v294_v27  ;;  %v956_v33 = vmul.f32 %v297_v59, %v292_v26  ;;  %v958_v37 = vmul.f32 %v318_v14, %v314_v28  ;;  %v960_v38 = vmul.f32 %v319_v17, %v316_v29 }
 0x101   : > { %v335_v57 = vmul.f32 %v897_v34, %v301_v1 }
 0x102   : > { %v336_v46 = vmul.f32 %v332_v47, %v954_v30  ;;  %v337_v49 = vmul.f32 %v332_v47, %v956_v33  ;;  %v969_v50 = vmul.f32 %v376_v48, %v954_v30  ;;  %v972_v51 = vmul.f32 %v376_v48, %v956_v33 }
 0x103   : > { %v351_v48 = vadd.f32 %v347_v62, %v335_v57 }
 0x104   : > { %v353_v52 = vadd.f32 %v349_v42, %v337_v49  ;;  %v974_v54 = vadd.f32 %v348_v40, %v336_v46 }
 0x106   : > { %v309_v59 = vpop.permute.xlu1 %308 }
 0x107   : > { %v313_v60 = vsel %vm312_vm7, %v305_v55, %v309_v59  ;;  %v315_v36 = vsel %vm312_vm7, %v309_v59, %v305_v55  ;;  %v784_v55 = vmov 256.0  }
 0x108   : > { %v322_v61 = vmul.f32 %v318_v14, %v313_v60  ;;  %v981_v47 = vmul.f32 %v319_v17, %v315_v36  ;;  %751 = vrcp.f32 %v784_v55 }
 0x10a   : > { %v363_v63 = vmul.f32 %v916_v45, %v981_v47  ;;  %v406_v2 = vmul.f32 %v400_v56, %v322_v61  ;;  %v407_v34 = vmul.f32 %v400_v56, %v981_v47 }
 0x10c   : > { %v367_v1 = vadd.f32 %v363_v63, %v351_v48  ;;  %v988_v3 = vadd.f32 %v406_v2, %v394_v19  ;;  %v990_v5 = vadd.f32 %v407_v34, %v395_v20 }
 0x10e   : > { %474 = vrot.lane.b32.xlu2 %v367_v1, %s783_s29  ;;  %v752_v6 = vpop.eup %751  ;;  %v365_v1 = vmul.f32 %v905_v39, %v960_v38 }
 0x10f   : > { %v529_v7 = vmul.f32 256.0, %v752_v6  ;;  %vm533_vm8 = vweird.f32 %v752_v6 }
 0x110   : > { %v369_v55 = vadd.f32 %v365_v1, %v353_v52 }
 0x111   : > { %v530_v35 = vsub.f32 1.0, %v529_v7 }
 0x113   : > { %v531_v8 = vmul.f32 %v752_v6, %v530_v35 }
 0x115   : > { %v532_v13 = vadd.f32 %v752_v6, %v531_v8 }
 0x117   : > { %v534_v14 = vsel %vm533_vm8, %v752_v6, %v532_v13  ;;  %v364_v6 = vmul.f32 %v905_v39, %v958_v37 }
 0x119   : > { %v368_v52 = vadd.f32 %v364_v6, %v974_v54 }
 0x131   : > { %v524_v17 = vpop.xlane.xlu1 %523 }
 0x132   : > { %v535_v21 = vmul.f32 %v534_v14, %v524_v17 }
 0x134   : > { %v537_v19 = vmul.f32 %v535_v21, %v819_v0 }
 0x136   : > { %v540_v25 = vsel %vm539_vm9, %v537_v19, 0.0 }
 0x139   : > { %v527_v56 = vpop.xlane.xlu2 %526 }
 0x13a   : > { %v536_v22 = vmul.f32 %v534_v14, %v527_v56 }
 0x13c   : > { %v538_v20 = vmul.f32 %v536_v22, %v827_v4 }
 0x13e   : > { %v541_v26 = vsel %vm539_vm9, %v538_v20, 0.0 }
 0x13f   : > { %v542_v27 = vadd.f32 %v541_v26, %v540_v25 }
 0x141   : > { %v543_v28 = vrot.slane %v542_v27, 4  ;;  %v420_v8 = vpop.permute.xlu2 %419 }
 0x142   : > { %v424_v17 = vmul.f32 %v420_v8, %v954_v30 }
 0x143   : > { %v544_v29 = vadd.f32 %v543_v28, %v542_v27 }
 0x145   : > { %v545_v40 = vrot.slane %v544_v29, 2 }
 0x147   : > { %v546_v42 = vadd.f32 %v545_v40, %v544_v29 }
 0x149   : > { %v428_v46 = vpop.permute.xlu1 %427  ;;  %v547_v49 = vrot.slane %v546_v42, 1 }
 0x14a   : > { %v434_v60 = vmul.f32 %v428_v46, %v881_v23 }
 0x14b   : > { %v548_v57 = vadd.f32 %v547_v49, %v546_v42 }
 0x14c   : > { %v438_v63 = vadd.f32 %v434_v60, %v940_v15  ;;  %v787_v15 = vmov 11  }
 0x14d   : > { %v549_v59 = vmax.f32 %v548_v57, 0.0 }
 0x14f   : > { %v557_v36 = vmul.f32 %v911_v43, %v549_v59  ;;  %v556_v62 = vmul.f32 %v909_v41, %v549_v59  ;;  %v362_v41 = vmul.f32 %v916_v45, %v322_v61 }
 0x151   : > { %562 = vrot.lane.b32.xlu0 %v557_v36, %s785_s30  ;;  %560 = vrot.lane.b32.xlu1 %v556_v62, %s785_s30  ;;  %v366_v43 = vadd.f32 %v362_v41, %v944_v18  ;;  %v392_v36 = vmul.f32 %v913_v44, %v887_v31 }
 0x152   : > { %v444_v48 = vpop.permute.xlu1 %443 }
 0x153   : > { %v450_v2 = vmul.f32 %v444_v48, %v322_v61  ;;  %v451_v45 = vmul.f32 %v444_v48, %v981_v47  ;;  %v425_v47 = vmul.f32 %v420_v8, %v956_v33  ;;  %v393_v48 = vmul.f32 %v913_v44, %v889_v32  ;;  %v693_v44 = vld [vmem:[%s1085_s2 + $0x3] ss:$4 sm:$0x3] }
 0x155   : > { %v454_v34 = vadd.f32 %v450_v2, %v438_v63  ;;  %v397_v41 = vadd.f32 %v393_v48, %v972_v51  ;;  %v510_v51 = vperm.slane %v693_v44, 0 }
 0x157   : > { %496 = vrot.lane.b32.xlu2 %v454_v34, %s786_s4  ;;  %v692_v34 = vld [vmem:[%s1085_s2 + $0x2] ss:$4 sm:$0x3] }
 0x159   : > { %447 = vperm.xlu0 %744, %v827_v4   ;;  %476 = vrot.lane.b32.xlu1 %v369_v55, %s783_s29  ;;  %v396_v55 = vadd.f32 %v392_v36, %v969_v50 }
 0x161   : > { %745 = vset.pattern.permute.xlu0 %v778_v58  ;;  %v435_v58 = vmul.f32 %v428_v46, %v883_v24 }
 0x162   : > { %403 = vperm.xlu0 %745, %v827_v4  }
 0x163   : > { %v439_v18 = vadd.f32 %v435_v58, %v942_v16 }
 0x165   : > { %v455_v61 = vadd.f32 %v451_v45, %v439_v18 }
 0x16a   : > { %470 = vrot.lane.b32.xlu0 %v366_v43, %s783_s29 }
 0x16b   : > { %746 = vset.pattern.permute.xlu0 %v787_v15 }
 0x172   : > { %472 = vrot.lane.b32.xlu0 %v368_v52, %s783_s29 }
 0x17a   : > { %459 = vperm.xlu0 %746, %v819_v0   ;;  %v432_v0 = vpop.permute.xlu2 %431 }
 0x17b   : > { %v437_v14 = vmul.f32 %v432_v0, %v889_v32 }
 0x17d   : > { %v441_v56 = vadd.f32 %v437_v14, %v425_v47 }
 0x182   : > { %463 = vperm.xlu0 %746, %v827_v4   ;;  %v436_v4 = vmul.f32 %v432_v0, %v887_v31  ;;  %v475_v27 = vpop.permute.xlu2 %474 }
 0x184   : > { %v440_v19 = vadd.f32 %v436_v4, %v424_v17 }
 0x18a   : > { %500 = vrot.lane.b32.xlu0 %v455_v61, %s786_s4 }
 0x1b1   : > { %v497_v29 = vpop.permute.xlu2 %496 }
 0x1c3   : > { %v563_v7 = vpop.permute.xlu0 %562  ;;  %v561_v39 = vpop.permute.xlu1 %560 }
 0x1c4   : > { %v570_v35 = vsel %vm566_vm10, %v563_v7, 0.0  ;;  %v567_v54 = vsel %vm566_vm10, %v561_v39, 0.0 }
 0x1c5   : > { %571 = vadd.xlane.f32.xlu1 %v570_v35  ;;  %568 = vadd.xlane.f32.xlu2 %v567_v54 }
 0x1cb   : > { %v448_v13 = vpop.permute.xlu0 %447  ;;  %v477_v33 = vpop.permute.xlu1 %476 }
 0x1cc   : > { %v453_v16 = vmul.f32 %v448_v13, %v960_v38  ;;  %v452_v21 = vmul.f32 %v448_v13, %v958_v37  ;;  %v511_v13 = vperm.slane %v693_v44, 1 }
 0x1ce   : > { %v457_v22 = vadd.f32 %v453_v16, %v441_v56  ;;  %v456_v20 = vadd.f32 %v452_v21, %v440_v19 }
 0x1d4   : > { %v404_v25 = vpop.permute.xlu0 %403 }
 0x1d5   : > { %v408_v63 = vmul.f32 %v404_v25, %v958_v37  ;;  %v409_v2 = vmul.f32 %v404_v25, %v960_v38  ;;  %v484_v37 = vperm.slane %v692_v34, 0  ;;  %v485_v38 = vperm.slane %v692_v34, 1 }
 0x1d7   : > { %v412_v52 = vadd.f32 %v408_v63, %v396_v55  ;;  %v413_v58 = vadd.f32 %v409_v2, %v397_v41 }
 0x1dc   : > { %v471_v26 = vpop.permute.xlu0 %470 }
 0x1dd   : > { %502 = vrot.lane.b32.xlu2 %v457_v22, %s786_s4  ;;  %v479_v15 = vsel %vm478_vm11, %v471_v26, %v475_v27  ;;  %v481_v6 = vsel %vm478_vm11, %v475_v27, %v471_v26 }
 0x1de   : > { %498 = vrot.lane.b32.xlu1 %v456_v20, %s786_s4  ;;  %v488_v8 = vmul.f32 %v484_v37, %v481_v6  ;;  %v489_v0 = vmul.f32 %v485_v38, %v479_v15 }
 0x1e4   : > { %v473_v28 = vpop.permute.xlu0 %472 }
 0x1e5   : > { %v480_v45 = vsel %vm478_vm11, %v473_v28, %v477_v33  ;;  %v482_v18 = vsel %vm478_vm11, %v477_v33, %v473_v28 }
 0x1e6   : > { %v490_v4 = vmul.f32 %v484_v37, %v482_v18  ;;  %v491_v47 = vmul.f32 %v485_v38, %v480_v45 }
 0x1ec   : > { %v460_v40 = vpop.permute.xlu0 %459 }
 0x1ed   : > { %v466_v50 = vadd.f32 %v460_v40, %v988_v3  ;;  %v467_v61 = vadd.f32 %v460_v40, %v990_v5 }
 0x1ef   : > { %v492_v17 = vadd.f32 %v488_v8, %v466_v50  ;;  %v493_v56 = vadd.f32 %v489_v0, %v467_v61 }
 0x1f4   : > { %v464_v57 = vpop.permute.xlu0 %463 }
 0x1f5   : > { %v468_v7 = vadd.f32 %v464_v57, %v412_v52  ;;  %v469_v39 = vadd.f32 %v464_v57, %v413_v58 }
 0x1f7   : > { %v494_v19 = vadd.f32 %v490_v4, %v468_v7  ;;  %v495_v22 = vadd.f32 %v491_v47, %v469_v39 }
 0x1fc   : > { %v501_v43 = vpop.permute.xlu0 %500 }
 0x1fd   : > { %v505_v35 = vsel %vm504_vm12, %v497_v29, %v501_v43  ;;  %v507_v16 = vsel %vm504_vm12, %v501_v43, %v497_v29 }
 0x1fe   : > { %v514_v21 = vmul.f32 %v510_v51, %v505_v35  ;;  %v515_v25 = vmul.f32 %v511_v13, %v507_v16 }
 0x200   : > { %v519_v37 = vadd.f32 %v515_v25, %v493_v56 }
 0x238   : > { %v569_v42 = vpop.xlane.xlu2 %568  ;;  %v572_v46 = vpop.xlane.xlu1 %571 }
 0x239   : > { %v694_v30 = vmul.f32 -1.442695, %v569_v42  ;;  %v695_v49 = vmul.f32 -1.442695, %v572_v46  ;;  %v518_v42 = vadd.f32 %v514_v21, %v492_v17 }
 0x23b   : > { %753 = vpow2.f32 %v694_v30 }
 0x23c   : > { %755 = vpow2.f32 %v695_v49 }
 0x240   : > { %v503_v30 = vpop.permute.xlu2 %502 }
 0x241   : > { %v754_v59 = vpop.eup %753 }
 0x242   : > { %v756_v60 = vpop.eup %755  ;;  %v1029_v62 = vadd.f32 1.0, %v754_v59 }
 0x243   : > { %v1038_v1 = vadd.f32 1.0, %v756_v60 }
 0x244   : > { %757 = vrcp.f32 %v1029_v62  ;;  %v590_v26 = vand.u32 2147483647, %v1029_v62  ;;  %v592_v27 = vand.u32 2147483648, %v1029_v62  ;;  %vm586_vm14 = vweird.f32 %v1029_v62 }
 0x245   : > { %759 = vrcp.f32 %v1038_v1  ;;  %v605_v29 = vand.u32 2147483647, %v1038_v1  ;;  %v607_v40 = vand.u32 2147483648, %v1038_v1  ;;  %vm601_vm0 = vweird.f32 %v1038_v1 }
 0x246   : > { %v593_v36 = vor.u32 1.1754944e-38, %v592_v27  ;;  %vm591_vm2 = vcmp.eq.f32.partialorder %v590_v26, 8.507059e+37 }
 0x247   : > { %vm606_vm4 = vcmp.eq.f32.partialorder %v605_v29, 8.507059e+37 }
 0x24a   : > { %v758_v54 = vpop.eup %757 }
 0x24b   : > { %v760_v14 = vpop.eup %759  ;;  %v582_v3 = vmul.f32 %v758_v54, %v1029_v62  ;;  %vm587_vm13 = vweird.f32 %v758_v54  ;;  %v608_v62 = vor.u32 1.1754944e-38, %v607_v40 }
 0x24c   : > { %v597_v5 = vmul.f32 %v760_v14, %v1038_v1  ;;  %vm602_vm15 = vweird.f32 %v760_v14  ;;  %vm588_vm1 = vmor %vm586_vm14, %vm587_vm13 }
 0x24d   : > { %v583_v20 = vsub.f32 1.0, %v582_v3  ;;  %vm603_vm3 = vmor %vm601_vm0, %vm602_vm15 }
 0x24e   : > { %v598_v28 = vsub.f32 1.0, %v597_v5 }
 0x24f   : > { %v584_v33 = vmul.f32 %v758_v54, %v583_v20 }
 0x250   : > { %v599_v46 = vmul.f32 %v760_v14, %v598_v28  ;;  %v499_v49 = vpop.permute.xlu1 %498 }
 0x251   : > { %v585_v57 = vadd.f32 %v758_v54, %v584_v33  ;;  %v506_v59 = vsel %vm504_vm12, %v499_v49, %v503_v30  ;;  %v508_v60 = vsel %vm504_vm12, %v503_v30, %v499_v49 }
 0x252   : > { %v600_v48 = vadd.f32 %v760_v14, %v599_v46  ;;  %v516_v63 = vmul.f32 %v510_v51, %v506_v59  ;;  %v517_v2 = vmul.f32 %v511_v13, %v508_v60 }
 0x253   : > { %v589_v34 = vsel %vm588_vm1, %v758_v54, %v585_v57 }
 0x254   : > { %v594_v55 = vsel %vm591_vm2, %v593_v36, %v589_v34  ;;  %v604_v41 = vsel %vm603_vm3, %v760_v14, %v600_v48  ;;  %v520_v1 = vadd.f32 %v516_v63, %v494_v19  ;;  %v521_v44 = vadd.f32 %v517_v2, %v495_v22 }
 0x255   : > { %v611_v38 = vmul.f32 %v594_v55, %v881_v23  ;;  %v612_v53 = vmul.f32 %v594_v55, %v883_v24  ;;  %v609_v43 = vsel %vm606_vm4, %v608_v62, %v604_v41 }
 0x256   : > { %v613_v15 = vmul.f32 %v609_v43, %v887_v31  ;;  %v614_v6 = vmul.f32 %v609_v43, %v889_v32 }
 0x257   : > { %v615_v52 = vmul.f32 %v611_v38, %v518_v42  ;;  %v616_v58 = vmul.f32 %v612_v53, %v519_v37 }
 0x258   : > { %v617_v45 = vmul.f32 %v613_v15, %v520_v1  ;;  %v618_v18 = vmul.f32 %v614_v6, %v521_v44 }
 0x259   : > { %v619_v50 = vadd.f32 %v615_v52, %v851_v9  ;;  %v620_v23 = vadd.f32 %v616_v58, %v853_v10 }
 0x25a   : > { %v621_v24 = vadd.f32 %v617_v45, %v855_v11  ;;  %v622_v51 = vadd.f32 %v618_v18, %v857_v12 }
 0x25b   : > { %623 = vst [vmem:[%s170_s11] sm:$0xff] %v619_v50 }
 0x25c   : > { %624 = vst [vmem:[%s170_s11 + $0x8] sm:$0xff] %v620_v23 }
 0x25d   : > { %625 = vst [vmem:[%s170_s11 + $0x10] sm:$0xff] %v621_v24 }
 0x25e   : > { %626 = vst [vmem:[%s170_s11 + $0x18] sm:$0xff] %v622_v51 }
 0x25f PF: > { %s13_s12 = sadd.s32 1, %s767_s12  }
 0x260   : > { %p10_p4 = scmp.ge.s32.totalorder %s13_s12, 4  }
 0x262   :  { %12 = sbr.rel (!%p10_p4) target bundleno = 1 (0x1), region = 65 }

</bundles_post_ra>
